<compile_context>
chip_gen: v7x
topology: tpu7x:2x2x1
jax: 0.10.0
libtpu: 0.0.40
codegen_flags: <defaults>
</compile_context>

<pallas_src>
import functools

import jax
import jax.numpy as jnp
from jax import lax
from jax.experimental import pallas as pl
from jax.experimental.pallas import tpu as pltpu

C_IN = 3        # RGB input channels
C_STEM = 16     # nominal stem channels
C_OUT = 32      # nominal output channels
C_PAD = 128     # lane-dense padded channel count (TPU lane width)
K_PAD = 32      # stem im2col K: 3*3*C_IN = 27 real columns padded to 32


# ------------------------------------------------------------------
# Fused kernel: stem 3x3/s2 (MXU) -> depthwise 3x3 (VPU) -> pointwise 1x1 (MXU)
# ------------------------------------------------------------------
def _mobilenet_fused_kernel(patch_ref, w_stem_ref, b_stem_ref,
                            w_dw_ref, b_dw_ref, w_pw_ref, b_pw_ref,
                            o_ref, xpad_ref, *, bb, ho, wo):
    c = o_ref.shape[-1]              # 128 lane-dense padded channels
    m = bb * ho * wo                 # matmul rows per grid step

    # ---- stem 3x3/s2 conv (+ folded BN + ReLU): ONE K=32 MXU matmul --------
    y = jnp.dot(patch_ref[...], w_stem_ref[...],
                preferred_element_type=jnp.float32)            # (m, c) f32
    y = jnp.maximum(y + b_stem_ref[...], 0.0)

    # ---- depthwise 3x3 (+ folded BN + ReLU) on the VPU ---------------------
    # Zero only the 1-wide halo border (interior is fully overwritten every
    # step); no full-tile zeroing pass, and correct even when the grid axis is
    # sharded across TensorCores (no reliance on program_id==0).
    wpad = xpad_ref.shape[2]
    zrow = jnp.zeros((bb, 1, wpad, c), jnp.float32)
    xpad_ref[:, 0:1, :, :] = zrow
    xpad_ref[:, ho + 1:ho + 2, :, :] = zrow
    zcol = jnp.zeros((bb, ho + 2, 1, c), jnp.float32)
    xpad_ref[:, :, 0:1, :] = zcol
    xpad_ref[:, :, wo + 1:wo + 2, :] = zcol
    xpad_ref[:, 1:1 + ho, 1:1 + wo, :] = y.reshape(bb, ho, wo, c)

    # TODO(synk): at large spatial tiles, replace the sublane-offset windows
    # below with pltpu.roll-based shifts (XLU) + boundary masks.
    w_dw = w_dw_ref[...]                                       # (9, c) f32
    acc = jnp.zeros((bb, ho, wo, c), jnp.float32)
    for kh in range(3):
        for kw in range(3):
            acc = acc + (xpad_ref[:, kh:kh + ho, kw:kw + wo, :]
                         * w_dw[kh * 3 + kw])
    h = jnp.maximum(acc + b_dw_ref[...], 0.0)

    # ---- pointwise 1x1 (+ folded BN + ReLU) on the MXU ---------------------
    h2 = h.reshape(m, c).astype(jnp.bfloat16)
    out = jnp.dot(h2, w_pw_ref[...], preferred_element_type=jnp.float32)
    o_ref[...] = jnp.maximum(out + b_pw_ref[...], 0.0).astype(o_ref.dtype)


def _pick_batch_block(n, rows_per_img, target_rows=256, max_rows=2048):
    """Largest divisor of n whose per-step row count stays VMEM-friendly,
    preferring >= ~256 rows so the 256-wide MXUs (v6e/v7x) are fed and the
    per-grid-step overhead is amortized on single-TC chips (v5e/v6e)."""
    best = 1
    for cand in range(1, n + 1):
        if n % cand == 0 and cand * rows_per_img <= max_rows:
            best = cand
            if cand * rows_per_img >= target_rows:
                break
    return best


def _mobilenet_fused(patch, params, *, n, ho, wo):
    rows_img = ho * wo
    assert rows_img % 8 == 0, "demo path assumes (H/2)*(W/2) divisible by 8"
    bb = _pick_batch_block(n, rows_img)
    m_blk = bb * rows_img
    grid = (n // bb,)
    wpad = ((wo + 2 + 7) // 8) * 8          # sublane-aligned scratch width
    n_rows = n * rows_img

    # Cost estimate uses nominal (useful) channel counts, consistently.
    flops = 2 * n_rows * (9 * C_IN * C_STEM + 9 * C_STEM + C_STEM * C_OUT)
    bytes_accessed = int(
        patch.size * patch.dtype.itemsize
        + sum(int(params[k].size) * params[k].dtype.itemsize
              for k in ("w_stem", "b_stem", "w_dw", "b_dw", "w_pw", "b_pw"))
        + n_rows * C_PAD * 4)

    kernel = functools.partial(_mobilenet_fused_kernel, bb=bb, ho=ho, wo=wo)
    return pl.pallas_call(
        kernel,
        out_shape=jax.ShapeDtypeStruct((n_rows, C_PAD), jnp.float32),
        grid=grid,
        in_specs=[
            pl.BlockSpec((m_blk, K_PAD), lambda i: (i, 0)),       # im2col patch
            pl.BlockSpec((K_PAD, C_PAD), lambda i: (0, 0)),       # stem weight
            pl.BlockSpec((1, C_PAD), lambda i: (0, 0)),           # stem bias
            pl.BlockSpec((9, C_PAD), lambda i: (0, 0)),           # dw weight
            pl.BlockSpec((1, C_PAD), lambda i: (0, 0)),           # dw bias
            pl.BlockSpec((C_PAD, C_PAD), lambda i: (0, 0)),       # pw weight
            pl.BlockSpec((1, C_PAD), lambda i: (0, 0)),           # pw bias
        ],
        out_specs=pl.BlockSpec((m_blk, C_PAD), lambda i: (i, 0)),
        scratch_shapes=[pltpu.VMEM((bb, ho + 2, wpad, C_PAD), jnp.float32)],
        compiler_params=pltpu.CompilerParams(
            dimension_semantics=("parallel",),
            vmem_limit_bytes=32 * 1024 * 1024,
        ),
        cost_estimate=pl.CostEstimate(flops=flops, transcendentals=0,
                                      bytes_accessed=bytes_accessed),
    )(patch, params["w_stem"], params["b_stem"], params["w_dw"],
      params["b_dw"], params["w_pw"], params["b_pw"])


# ------------------------------------------------------------------
# Params (BN folded INTO the conv weights; channels zero-padded to 128 lanes)
# ------------------------------------------------------------------
def _fold_bn(gamma, beta, mean, var, eps=1e-5):
    scale = gamma / jnp.sqrt(var + eps)
    bias = beta - mean * scale
    return scale, bias


def init_params(key, c_in=C_IN, c_stem=C_STEM, c_out=C_OUT,
                c_pad=C_PAD, k_pad=K_PAD):
    ks = jax.random.split(key, 15)
    p = {}

    # stem 3x3/s2 conv, BN scale folded into the weight, bias kept separately.
    w_stem = 0.1 * jax.random.normal(ks[0], (3, 3, c_in, c_stem), jnp.float32)
    s1, b1 = _fold_bn(1.0 + 0.1 * jax.random.normal(ks[1], (c_stem,)),
                      0.05 * jax.random.normal(ks[2], (c_stem,)),
                      0.1 * jax.random.normal(ks[3], (c_stem,)),
                      jnp.abs(jax.random.normal(ks[4], (c_stem,))) + 0.5)
    w_stem2d = (w_stem * s1).reshape(9 * c_in, c_stem)   # row = (kh*3+kw)*3 + ci
    p["w_stem"] = (jnp.zeros((k_pad, c_pad), jnp.float32)
                   .at[:9 * c_in, :c_stem].set(w_stem2d).astype(jnp.bfloat16))
    p["b_stem"] = jnp.zeros((1, c_pad), jnp.float32).at[0, :c_stem].set(b1)

    # depthwise 3x3, BN scale folded into the per-channel weights.
    w_dw = 0.1 * jax.random.normal(ks[5], (9, c_stem), jnp.float32)
    s2, b2 = _fold_bn(1.0 + 0.1 * jax.random.normal(ks[6], (c_stem,)),
                      0.05 * jax.random.normal(ks[7], (c_stem,)),
                      0.1 * jax.random.normal(ks[8], (c_stem,)),
                      jnp.abs(jax.random.normal(ks[9], (c_stem,))) + 0.5)
    p["w_dw"] = (jnp.zeros((9, c_pad), jnp.float32)
                 .at[:, :c_stem].set(w_dw * s2))
    p["b_dw"] = jnp.zeros((1, c_pad), jnp.float32).at[0, :c_stem].set(b2)

    # pointwise 1x1, BN scale folded into the weight.
    w_pw = 0.1 * jax.random.normal(ks[10], (c_stem, c_out), jnp.float32)
    s3, b3 = _fold_bn(1.0 + 0.1 * jax.random.normal(ks[11], (c_out,)),
                      0.05 * jax.random.normal(ks[12], (c_out,)),
                      0.1 * jax.random.normal(ks[13], (c_out,)),
                      jnp.abs(jax.random.normal(ks[14], (c_out,))) + 0.5)
    p["w_pw"] = (jnp.zeros((c_pad, c_pad), jnp.float32)
                 .at[:c_stem, :c_out].set(w_pw * s3).astype(jnp.bfloat16))
    p["b_pw"] = jnp.zeros((1, c_pad), jnp.float32).at[0, :c_out].set(b3)
    return p


# ------------------------------------------------------------------
# Forward
# ------------------------------------------------------------------
@jax.jit
def mobilenet_forward(x_nchw, params):
    n, c_in, h, w = x_nchw.shape
    assert h % 2 == 0 and w % 2 == 0, "stem stride-2 demo path assumes even H,W"
    ho, wo = h // 2, w // 2

    x = jnp.transpose(x_nchw, (0, 2, 3, 1)).astype(jnp.float32)    # NCHW -> NHWC
    xp = jnp.pad(x, ((0, 0), (1, 1), (1, 1), (0, 0)))              # (n, h+2, w+2, c)

    # Lane-dense im2col for the stride-2 3x3 stem: 27 real columns (tap-major,
    # channel-minor) padded to K_PAD=32 on the minor (lane) axis; bf16 halves
    # its HBM footprint (same rounding the MXU would apply anyway).
    taps = [xp[:, kh:kh + h:2, kw:kw + w:2, :]
            for kh in range(3) for kw in range(3)]                 # 9 x (n,ho,wo,c_in)
    patch = jnp.concatenate(
        taps + [jnp.zeros((n, ho, wo, K_PAD - 9 * c_in), jnp.float32)], axis=-1)
    patch = patch.reshape(n * ho * wo, K_PAD).astype(jnp.bfloat16)

    out2d = _mobilenet_fused(patch, params, n=n, ho=ho, wo=wo)     # (n*ho*wo, 128)
    z = out2d.reshape(n, ho, wo, C_PAD)[..., :C_OUT]               # drop lane pad
    return jnp.transpose(z, (0, 3, 1, 2))                          # NHWC -> NCHW


# ------------------------------------------------------------------
# Pure-JAX reference (independent conv ops; f32 math on bf16-rounded inputs)
# ------------------------------------------------------------------
def reference_forward(x_nchw, params, c_in=C_IN, c_out=C_OUT, c_pad=C_PAD):
    x = jnp.transpose(x_nchw, (0, 2, 3, 1)).astype(jnp.float32)
    # Mirror the kernel path's input quantization (patch is stored in bf16).
    x = x.astype(jnp.bfloat16).astype(jnp.float32)
    w_stem = params["w_stem"].astype(jnp.float32)[:9 * c_in].reshape(3, 3, c_in, c_pad)
    y = lax.conv_general_dilated(x, w_stem, (2, 2), ((1, 1), (1, 1)),
                                 dimension_numbers=("NHWC", "HWIO", "NHWC"),
                                 precision=lax.Precision.HIGHEST)
    y = jnp.maximum(y + params["b_stem"].reshape(1, 1, 1, -1), 0.0)
    w_dw = params["w_dw"].reshape(3, 3, 1, c_pad)
    h = lax.conv_general_dilated(y, w_dw, (1, 1), ((1, 1), (1, 1)),
                                 dimension_numbers=("NHWC", "HWIO", "NHWC"),
                                 feature_group_count=c_pad,
                                 precision=lax.Precision.HIGHEST)
    h = jnp.maximum(h + params["b_dw"].reshape(1, 1, 1, -1), 0.0)
    z = jnp.einsum("nhwc,cd->nhwd", h, params["w_pw"].astype(jnp.float32),
                   precision=lax.Precision.HIGHEST)
    z = jnp.maximum(z + params["b_pw"].reshape(1, 1, 1, -1), 0.0)
    return jnp.transpose(z[..., :c_out], (0, 3, 1, 2))


if __name__ == "__main__":
    key = jax.random.PRNGKey(0)
    k_x, k_p = jax.random.split(key)
    x = jax.random.normal(k_x, (2, C_IN, 16, 16), jnp.float32)     # NCHW input
    params = init_params(k_p)

    out = mobilenet_forward(x, params)
    out = jax.block_until_ready(out)
    assert out.shape == (2, C_OUT, 8, 8), out.shape
    assert bool(jnp.all(jnp.isfinite(out)))

    ref = reference_forward(x, params)
    err = float(jnp.max(jnp.abs(out - ref)))
    assert err < 2e-2, f"max abs err vs reference: {err}"
    print("KERNEL_OK")
</pallas_src>

<mosaic_0001>
module attributes {stable_mosaic.version = 11 : i64} {
  func.func @_mobilenet_fused_kernel(%arg0: i32, %arg1: memref<128x32xbf16, #tpu.memory_space<vmem>>, %arg2: memref<32x128xbf16, #tpu.memory_space<vmem>>, %arg3: memref<1x128xf32, #tpu.memory_space<vmem>>, %arg4: memref<9x128xf32, #tpu.memory_space<vmem>>, %arg5: memref<1x128xf32, #tpu.memory_space<vmem>>, %arg6: memref<128x128xbf16, #tpu.memory_space<vmem>>, %arg7: memref<1x128xf32, #tpu.memory_space<vmem>>, %arg8: memref<128x128xf32, #tpu.memory_space<vmem>>, %arg9: memref<2x10x16x128xf32, #tpu.memory_space<vmem>>) attributes {dimension_semantics = [#tpu.dimension_semantics<parallel>], iteration_bounds = array<i64: 1>, scalar_prefetch = 0 : i64, scratch_operands = 1 : i64, tpu.core_type = #tpu.core_type<tc>, window_params = [{transform_indices = @transform_0, window_bounds = array<i64: 128, 32>}, {pipeline_mode = #tpu.pipeline_mode<synchronous>, transform_indices = @transform_1, window_bounds = array<i64: 32, 128>}, {pipeline_mode = #tpu.pipeline_mode<synchronous>, transform_indices = @transform_2, window_bounds = array<i64: 1, 128>}, {pipeline_mode = #tpu.pipeline_mode<synchronous>, transform_indices = @transform_3, window_bounds = array<i64: 9, 128>}, {pipeline_mode = #tpu.pipeline_mode<synchronous>, transform_indices = @transform_4, window_bounds = array<i64: 1, 128>}, {pipeline_mode = #tpu.pipeline_mode<synchronous>, transform_indices = @transform_5, window_bounds = array<i64: 128, 128>}, {pipeline_mode = #tpu.pipeline_mode<synchronous>, transform_indices = @transform_6, window_bounds = array<i64: 1, 128>}, {transform_indices = @transform_7, window_bounds = array<i64: 128, 128>}]} {
    %c0 = arith.constant 0 : index
    %c0_0 = arith.constant 0 : index
    %0 = vector.load %arg1[%c0, %c0_0] : memref<128x32xbf16, #tpu.memory_space<vmem>>, vector<128x32xbf16>
    %c0_1 = arith.constant 0 : index
    %c0_2 = arith.constant 0 : index
    %1 = vector.load %arg2[%c0_1, %c0_2] : memref<32x128xbf16, #tpu.memory_space<vmem>>, vector<32x128xbf16>
    %cst = arith.constant dense<0.000000e+00> : vector<128x128xf32>
    %2 = tpu.matmul %0, %1, %cst {dimension_numbers = #tpu.dot_dimension_numbers<[1], [0], [0], [1], [0, 0, 1, 1], [], []>} : vector<128x32xbf16>, vector<32x128xbf16>, vector<128x128xf32> -> vector<128x128xf32>
    %c0_3 = arith.constant 0 : index
    %c0_4 = arith.constant 0 : index
    %3 = vector.load %arg3[%c0_3, %c0_4] : memref<1x128xf32, #tpu.memory_space<vmem>>, vector<1x128xf32>
    %4 = vector.broadcast %3 : vector<1x128xf32> to vector<128x128xf32>
    %5 = arith.addf %2, %4 : vector<128x128xf32>
    %cst_5 = arith.constant 0.000000e+00 : f32
    %6 = vector.broadcast %cst_5 : f32 to vector<128x128xf32>
    %7 = arith.maximumf %5, %6 : vector<128x128xf32>
    %cst_6 = arith.constant 0.000000e+00 : f32
    %8 = vector.broadcast %cst_6 : f32 to vector<2x1x16x128xf32>
    %c0_7 = arith.constant 0 : index
    %c0_8 = arith.constant 0 : index
    %c0_9 = arith.constant 0 : index
    %c0_10 = arith.constant 0 : index
    %9 = vector.load %arg9[%c0_7, %c0_8, %c0_9, %c0_10] : memref<2x10x16x128xf32, #tpu.memory_space<vmem>>, vector<2x1x16x128xf32>
    tpu.vector_store %arg9[%c0_7, %c0_8, %c0_9, %c0_10], %8 {strides = array<i32>} : memref<2x10x16x128xf32, #tpu.memory_space<vmem>>, vector<2x1x16x128xf32>,
    %c0_11 = arith.constant 0 : index
    %c9 = arith.constant 9 : index
    %c0_12 = arith.constant 0 : index
    %c0_13 = arith.constant 0 : index
    %10 = vector.load %arg9[%c0_11, %c9, %c0_12, %c0_13] : memref<2x10x16x128xf32, #tpu.memory_space<vmem>>, vector<2x1x16x128xf32>
    tpu.vector_store %arg9[%c0_11, %c9, %c0_12, %c0_13], %8 {strides = array<i32>} : memref<2x10x16x128xf32, #tpu.memory_space<vmem>>, vector<2x1x16x128xf32>,
    %cst_14 = arith.constant 0.000000e+00 : f32
    %11 = vector.broadcast %cst_14 : f32 to vector<2x10x1x128xf32>
    %c0_15 = arith.constant 0 : index
    %c0_16 = arith.constant 0 : index
    %c0_17 = arith.constant 0 : index
    %c0_18 = arith.constant 0 : index
    %12 = vector.load %arg9[%c0_15, %c0_16, %c0_17, %c0_18] : memref<2x10x16x128xf32, #tpu.memory_space<vmem>>, vector<2x10x1x128xf32>
    tpu.vector_store %arg9[%c0_15, %c0_16, %c0_17, %c0_18], %11 {strides = array<i32>} : memref<2x10x16x128xf32, #tpu.memory_space<vmem>>, vector<2x10x1x128xf32>,
    %c0_19 = arith.constant 0 : index
    %c0_20 = arith.constant 0 : index
    %c9_21 = arith.constant 9 : index
    %c0_22 = arith.constant 0 : index
    %13 = vector.load %arg9[%c0_19, %c0_20, %c9_21, %c0_22] : memref<2x10x16x128xf32, #tpu.memory_space<vmem>>, vector<2x10x1x128xf32>
    tpu.vector_store %arg9[%c0_19, %c0_20, %c9_21, %c0_22], %11 {strides = array<i32>} : memref<2x10x16x128xf32, #tpu.memory_space<vmem>>, vector<2x10x1x128xf32>,
    %14 = vector.shape_cast %7 : vector<128x128xf32> to vector<2x8x8x128xf32>
    %c0_23 = arith.constant 0 : index
    %c1 = arith.constant 1 : index
    %c1_24 = arith.constant 1 : index
    %c0_25 = arith.constant 0 : index
    %15 = vector.load %arg9[%c0_23, %c1, %c1_24, %c0_25] : memref<2x10x16x128xf32, #tpu.memory_space<vmem>>, vector<2x8x8x128xf32>
    tpu.vector_store %arg9[%c0_23, %c1, %c1_24, %c0_25], %14 {strides = array<i32>} : memref<2x10x16x128xf32, #tpu.memory_space<vmem>>, vector<2x8x8x128xf32>,
    %c0_26 = arith.constant 0 : index
    %c0_27 = arith.constant 0 : index
    %16 = vector.load %arg4[%c0_26, %c0_27] : memref<9x128xf32, #tpu.memory_space<vmem>>, vector<9x128xf32>
    %cst_28 = arith.constant 0.000000e+00 : f32
    %17 = vector.broadcast %cst_28 : f32 to vector<2x8x8x128xf32>
    %c0_29 = arith.constant 0 : index
    %c0_30 = arith.constant 0 : index
    %c0_31 = arith.constant 0 : index
    %c0_32 = arith.constant 0 : index
    %18 = vector.load %arg9[%c0_29, %c0_30, %c0_31, %c0_32] : memref<2x10x16x128xf32, #tpu.memory_space<vmem>>, vector<2x8x8x128xf32>
    %19 = vector.extract_strided_slice %16 {offsets = [0, 0], sizes = [1, 128], strides = [1, 1]} : vector<9x128xf32> to vector<1x128xf32>
    %20 = vector.shape_cast %19 : vector<1x128xf32> to vector<128xf32>
    %21 = vector.shape_cast %20 : vector<128xf32> to vector<1x1x1x128xf32>
    %22 = vector.broadcast %21 : vector<1x1x1x128xf32> to vector<2x8x8x128xf32>
    %23 = arith.mulf %18, %22 : vector<2x8x8x128xf32>
    %24 = arith.addf %17, %23 : vector<2x8x8x128xf32>
    %c0_33 = arith.constant 0 : index
    %c0_34 = arith.constant 0 : index
    %c1_35 = arith.constant 1 : index
    %c0_36 = arith.constant 0 : index
    %25 = vector.load %arg9[%c0_33, %c0_34, %c1_35, %c0_36] : memref<2x10x16x128xf32, #tpu.memory_space<vmem>>, vector<2x8x8x128xf32>
    %26 = vector.extract_strided_slice %16 {offsets = [1, 0], sizes = [1, 128], strides = [1, 1]} : vector<9x128xf32> to vector<1x128xf32>
    %27 = vector.shape_cast %26 : vector<1x128xf32> to vector<128xf32>
    %28 = vector.shape_cast %27 : vector<128xf32> to vector<1x1x1x128xf32>
    %29 = vector.broadcast %28 : vector<1x1x1x128xf32> to vector<2x8x8x128xf32>
    %30 = arith.mulf %25, %29 : vector<2x8x8x128xf32>
    %31 = arith.addf %24, %30 : vector<2x8x8x128xf32>
    %c0_37 = arith.constant 0 : index
    %c0_38 = arith.constant 0 : index
    %c2 = arith.constant 2 : index
    %c0_39 = arith.constant 0 : index
    %32 = vector.load %arg9[%c0_37, %c0_38, %c2, %c0_39] : memref<2x10x16x128xf32, #tpu.memory_space<vmem>>, vector<2x8x8x128xf32>
    %33 = vector.extract_strided_slice %16 {offsets = [2, 0], sizes = [1, 128], strides = [1, 1]} : vector<9x128xf32> to vector<1x128xf32>
    %34 = vector.shape_cast %33 : vector<1x128xf32> to vector<128xf32>
    %35 = vector.shape_cast %34 : vector<128xf32> to vector<1x1x1x128xf32>
    %36 = vector.broadcast %35 : vector<1x1x1x128xf32> to vector<2x8x8x128xf32>
    %37 = arith.mulf %32, %36 : vector<2x8x8x128xf32>
    %38 = arith.addf %31, %37 : vector<2x8x8x128xf32>
    %c0_40 = arith.constant 0 : index
    %c1_41 = arith.constant 1 : index
    %c0_42 = arith.constant 0 : index
    %c0_43 = arith.constant 0 : index
    %39 = vector.load %arg9[%c0_40, %c1_41, %c0_42, %c0_43] : memref<2x10x16x128xf32, #tpu.memory_space<vmem>>, vector<2x8x8x128xf32>
    %40 = vector.extract_strided_slice %16 {offsets = [3, 0], sizes = [1, 128], strides = [1, 1]} : vector<9x128xf32> to vector<1x128xf32>
    %41 = vector.shape_cast %40 : vector<1x128xf32> to vector<128xf32>
    %42 = vector.shape_cast %41 : vector<128xf32> to vector<1x1x1x128xf32>
    %43 = vector.broadcast %42 : vector<1x1x1x128xf32> to vector<2x8x8x128xf32>
    %44 = arith.mulf %39, %43 : vector<2x8x8x128xf32>
    %45 = arith.addf %38, %44 : vector<2x8x8x128xf32>
    %c0_44 = arith.constant 0 : index
    %c1_45 = arith.constant 1 : index
    %c1_46 = arith.constant 1 : index
    %c0_47 = arith.constant 0 : index
    %46 = vector.load %arg9[%c0_44, %c1_45, %c1_46, %c0_47] : memref<2x10x16x128xf32, #tpu.memory_space<vmem>>, vector<2x8x8x128xf32>
    %47 = vector.extract_strided_slice %16 {offsets = [4, 0], sizes = [1, 128], strides = [1, 1]} : vector<9x128xf32> to vector<1x128xf32>
    %48 = vector.shape_cast %47 : vector<1x128xf32> to vector<128xf32>
    %49 = vector.shape_cast %48 : vector<128xf32> to vector<1x1x1x128xf32>
    %50 = vector.broadcast %49 : vector<1x1x1x128xf32> to vector<2x8x8x128xf32>
    %51 = arith.mulf %46, %50 : vector<2x8x8x128xf32>
    %52 = arith.addf %45, %51 : vector<2x8x8x128xf32>
    %c0_48 = arith.constant 0 : index
    %c1_49 = arith.constant 1 : index
    %c2_50 = arith.constant 2 : index
    %c0_51 = arith.constant 0 : index
    %53 = vector.load %arg9[%c0_48, %c1_49, %c2_50, %c0_51] : memref<2x10x16x128xf32, #tpu.memory_space<vmem>>, vector<2x8x8x128xf32>
    %54 = vector.extract_strided_slice %16 {offsets = [5, 0], sizes = [1, 128], strides = [1, 1]} : vector<9x128xf32> to vector<1x128xf32>
    %55 = vector.shape_cast %54 : vector<1x128xf32> to vector<128xf32>
    %56 = vector.shape_cast %55 : vector<128xf32> to vector<1x1x1x128xf32>
    %57 = vector.broadcast %56 : vector<1x1x1x128xf32> to vector<2x8x8x128xf32>
    %58 = arith.mulf %53, %57 : vector<2x8x8x128xf32>
    %59 = arith.addf %52, %58 : vector<2x8x8x128xf32>
    %c0_52 = arith.constant 0 : index
    %c2_53 = arith.constant 2 : index
    %c0_54 = arith.constant 0 : index
    %c0_55 = arith.constant 0 : index
    %60 = vector.load %arg9[%c0_52, %c2_53, %c0_54, %c0_55] : memref<2x10x16x128xf32, #tpu.memory_space<vmem>>, vector<2x8x8x128xf32>
    %61 = vector.extract_strided_slice %16 {offsets = [6, 0], sizes = [1, 128], strides = [1, 1]} : vector<9x128xf32> to vector<1x128xf32>
    %62 = vector.shape_cast %61 : vector<1x128xf32> to vector<128xf32>
    %63 = vector.shape_cast %62 : vector<128xf32> to vector<1x1x1x128xf32>
    %64 = vector.broadcast %63 : vector<1x1x1x128xf32> to vector<2x8x8x128xf32>
    %65 = arith.mulf %60, %64 : vector<2x8x8x128xf32>
    %66 = arith.addf %59, %65 : vector<2x8x8x128xf32>
    %c0_56 = arith.constant 0 : index
    %c2_57 = arith.constant 2 : index
    %c1_58 = arith.constant 1 : index
    %c0_59 = arith.constant 0 : index
    %67 = vector.load %arg9[%c0_56, %c2_57, %c1_58, %c0_59] : memref<2x10x16x128xf32, #tpu.memory_space<vmem>>, vector<2x8x8x128xf32>
    %68 = vector.extract_strided_slice %16 {offsets = [7, 0], sizes = [1, 128], strides = [1, 1]} : vector<9x128xf32> to vector<1x128xf32>
    %69 = vector.shape_cast %68 : vector<1x128xf32> to vector<128xf32>
    %70 = vector.shape_cast %69 : vector<128xf32> to vector<1x1x1x128xf32>
    %71 = vector.broadcast %70 : vector<1x1x1x128xf32> to vector<2x8x8x128xf32>
    %72 = arith.mulf %67, %71 : vector<2x8x8x128xf32>
    %73 = arith.addf %66, %72 : vector<2x8x8x128xf32>
    %c0_60 = arith.constant 0 : index
    %c2_61 = arith.constant 2 : index
    %c2_62 = arith.constant 2 : index
    %c0_63 = arith.constant 0 : index
    %74 = vector.load %arg9[%c0_60, %c2_61, %c2_62, %c0_63] : memref<2x10x16x128xf32, #tpu.memory_space<vmem>>, vector<2x8x8x128xf32>
    %75 = vector.extract_strided_slice %16 {offsets = [8, 0], sizes = [1, 128], strides = [1, 1]} : vector<9x128xf32> to vector<1x128xf32>
    %76 = vector.shape_cast %75 : vector<1x128xf32> to vector<128xf32>
    %77 = vector.shape_cast %76 : vector<128xf32> to vector<1x1x1x128xf32>
    %78 = vector.broadcast %77 : vector<1x1x1x128xf32> to vector<2x8x8x128xf32>
    %79 = arith.mulf %74, %78 : vector<2x8x8x128xf32>
    %80 = arith.addf %73, %79 : vector<2x8x8x128xf32>
    %c0_64 = arith.constant 0 : index
    %c0_65 = arith.constant 0 : index
    %81 = vector.load %arg5[%c0_64, %c0_65] : memref<1x128xf32, #tpu.memory_space<vmem>>, vector<1x128xf32>
    %82 = vector.shape_cast %81 : vector<1x128xf32> to vector<1x1x1x128xf32>
    %83 = vector.broadcast %82 : vector<1x1x1x128xf32> to vector<2x8x8x128xf32>
    %84 = arith.addf %80, %83 : vector<2x8x8x128xf32>
    %cst_66 = arith.constant 0.000000e+00 : f32
    %85 = vector.broadcast %cst_66 : f32 to vector<2x8x8x128xf32>
    %86 = arith.maximumf %84, %85 : vector<2x8x8x128xf32>
    %87 = vector.shape_cast %86 : vector<2x8x8x128xf32> to vector<128x128xf32>
    %88 = arith.truncf %87 : vector<128x128xf32> to vector<128x128xbf16>
    %c0_67 = arith.constant 0 : index
    %c0_68 = arith.constant 0 : index
    %89 = vector.load %arg6[%c0_67, %c0_68] : memref<128x128xbf16, #tpu.memory_space<vmem>>, vector<128x128xbf16>
    %cst_69 = arith.constant dense<0.000000e+00> : vector<128x128xf32>
    %90 = tpu.matmul %88, %89, %cst_69 {dimension_numbers = #tpu.dot_dimension_numbers<[1], [0], [0], [1], [0, 0, 1, 1], [], []>} : vector<128x128xbf16>, vector<128x128xbf16>, vector<128x128xf32> -> vector<128x128xf32>
    %c0_70 = arith.constant 0 : index
    %c0_71 = arith.constant 0 : index
    %91 = vector.load %arg7[%c0_70, %c0_71] : memref<1x128xf32, #tpu.memory_space<vmem>>, vector<1x128xf32>
    %92 = vector.broadcast %91 : vector<1x128xf32> to vector<128x128xf32>
    %93 = arith.addf %90, %92 : vector<128x128xf32>
    %cst_72 = arith.constant 0.000000e+00 : f32
    %94 = vector.broadcast %cst_72 : f32 to vector<128x128xf32>
    %95 = arith.maximumf %93, %94 : vector<128x128xf32>
    %c0_73 = arith.constant 0 : index
    %c0_74 = arith.constant 0 : index
    %96 = vector.load %arg8[%c0_73, %c0_74] : memref<128x128xf32, #tpu.memory_space<vmem>>, vector<128x128xf32>
    tpu.vector_store %arg8[%c0_73, %c0_74], %95 {strides = array<i32>} : memref<128x128xf32, #tpu.memory_space<vmem>>, vector<128x128xf32>,
    return
  }
  func.func @transform_0(%arg0: i32) -> (i32, i32) {
    %c0_i32 = arith.constant 0 : i32
    %c0_i32_0 = arith.constant 0 : i32
    return %arg0, %c0_i32 : i32, i32
  }
  func.func @transform_1(%arg0: i32) -> (i32, i32) {
    %c0_i32 = arith.constant 0 : i32
    %c0_i32_0 = arith.constant 0 : i32
    %c0_i32_1 = arith.constant 0 : i32
    return %c0_i32, %c0_i32_0 : i32, i32
  }
  func.func @transform_2(%arg0: i32) -> (i32, i32) {
    %c0_i32 = arith.constant 0 : i32
    %c0_i32_0 = arith.constant 0 : i32
    %c0_i32_1 = arith.constant 0 : i32
    return %c0_i32, %c0_i32_0 : i32, i32
  }
  func.func @transform_3(%arg0: i32) -> (i32, i32) {
    %c0_i32 = arith.constant 0 : i32
    %c0_i32_0 = arith.constant 0 : i32
    %c0_i32_1 = arith.constant 0 : i32
    return %c0_i32, %c0_i32_0 : i32, i32
  }
  func.func @transform_4(%arg0: i32) -> (i32, i32) {
    %c0_i32 = arith.constant 0 : i32
    %c0_i32_0 = arith.constant 0 : i32
    %c0_i32_1 = arith.constant 0 : i32
    return %c0_i32, %c0_i32_0 : i32, i32
  }
  func.func @transform_5(%arg0: i32) -> (i32, i32) {
    %c0_i32 = arith.constant 0 : i32
    %c0_i32_0 = arith.constant 0 : i32
    %c0_i32_1 = arith.constant 0 : i32
    return %c0_i32, %c0_i32_0 : i32, i32
  }
  func.func @transform_6(%arg0: i32) -> (i32, i32) {
    %c0_i32 = arith.constant 0 : i32
    %c0_i32_0 = arith.constant 0 : i32
    %c0_i32_1 = arith.constant 0 : i32
    return %c0_i32, %c0_i32_0 : i32, i32
  }
  func.func @transform_7(%arg0: i32) -> (i32, i32) {
    %c0_i32 = arith.constant 0 : i32
    %c0_i32_0 = arith.constant 0 : i32
    return %arg0, %c0_i32 : i32, i32
  }
}

</mosaic_0001>

<bundles_post_ra>
// kernel: mobilenet_forward.1
= control target key start
LH: loop header
LB: loop body
LE: loop exit
PB: predicated region body
PF: predicated region fallthrough
CT: control target
= control target key end

     0   :  { %vm106_vm0 = vcmask 261120   ;;  %v1175_v10 = vmov 0.0   ;;  %v328_v19 = vlaneseq  ;;  %s1640_s1 = inlined_call_operand.vmem [shape: bf16[32,128], index: 1, kind: input, shape index: {}]   ;;  %s1641_s0 = inlined_call_operand.vmem [shape: bf16[128,32], index: 0, kind: input, shape index: {}]   ;;  %s1642_s5 = inlined_call_operand.vmem [shape: bf16[128,128], index: 5, kind: input, shape index: {}]   ;;  %s1643_s3 = inlined_call_operand.vmem [shape: f32[9,128], index: 3, kind: input, shape index: {}]   ;;  %s1644_s2 = inlined_call_operand.vmem [shape: f32[1,128], index: 2, kind: input, shape index: {}]   ;;  %s1645_s4 = inlined_call_operand.vmem [shape: f32[1,128], index: 4, kind: input, shape index: {}]   ;;  %s1646_s6 = inlined_call_operand.vmem [shape: f32[1,128], index: 6, kind: input, shape index: {}]   ;;  %s1647_s7 = inlined_call_operand.vmem [shape: f32[128,128], index: 7, kind: output, shape index: {}]  }
   0x1   :  { %v1157_v0 = vld [vmem:[%s1640_s1] sm:$0xff]   ;;  %v1158_v1 = vld [vmem:[%s1640_s1 + $0x8] sm:$0xff]   ;;  %v1161_v4 = vld [vmem:[%s1641_s0 + $0x10] sm:$0xff]   ;;  %244 = vst [vmem:[#allocation2] sm:$0xff] %v1175_v10 }
   0x2   :  { %1088 = vmatprep.subr.bf16.mxu0 %v1157_v0  ;;  %v1159_v2 = vld [vmem:[%s1641_s0] sm:$0xff]   ;;  %v1160_v3 = vld [vmem:[%s1641_s0 + $0x8] sm:$0xff]   ;;  %v1162_v5 = vld [vmem:[%s1641_s0 + $0x18] sm:$0xff]   ;;  %245 = vst [vmem:[#allocation2 + $0x8] sm:$0xff] %v1175_v10  ;;  %v329_v20 = vshrl.u32 %v328_v19, 7 }
   0x3   :  { %1089 = vmatpush3.bf16.msra.mxu0 %v1157_v0  ;;  %1092 = vmatprep.mubr.msk.bf16.mxu0 %vm106_vm0, %v1159_v2  ;;  %v1163_v6 = vld [vmem:[%s1641_s0 + $0x20] sm:$0xff]   ;;  %v1164_v7 = vld [vmem:[%s1641_s0 + $0x28] sm:$0xff]   ;;  %v1165_v8 = vld [vmem:[%s1641_s0 + $0x30] sm:$0xff]   ;;  %254 = vst [vmem:[#allocation2 + $0x10] sm:$0x1] %v1175_v10 }
   0x4   :  { %1090 = vmatprep.subr.bf16.mxu0 %v1158_v1  ;;  %v1166_v9 = vld [vmem:[%s1641_s0 + $0x38] sm:$0xff]   ;;  %255 = vst [vmem:[#allocation2 + $0x20] sm:$0x1] %v1175_v10  ;;  %256 = vst [vmem:[#allocation2 + $0x30] sm:$0x1] %v1175_v10  ;;  %v1167_v11 = vld [vmem:[%s1642_s5] sm:$0xff]  }
   0x5   :  { %274 = vst [vmem:[#allocation2 + $0x19] sm:$0x1] %v1175_v10  ;;  %275 = vst [vmem:[#allocation2 + $0x29] sm:$0x1] %v1175_v10  ;;  %1140 = vmatprep.subr.bf16.mxu1 %v1167_v11  ;;  %v1168_v12 = vld [vmem:[%s1642_s5 + $0x8] sm:$0xff]   ;;  %v1169_v13 = vld [vmem:[%s1642_s5 + $0x10] sm:$0xff]  }
   0x6   :  { %276 = vst [vmem:[#allocation2 + $0x39] sm:$0x1] %v1175_v10  ;;  %246 = vst [vmem:[#allocation2 + $0xa0] sm:$0xff] %v1175_v10  ;;  %1148 = vmatpush3.bf16.msra.mxu1 %v1167_v11  ;;  %v1170_v14 = vld [vmem:[%s1642_s5 + $0x18] sm:$0xff]   ;;  %v1171_v15 = vld [vmem:[%s1642_s5 + $0x20] sm:$0xff]   ;;  %v330_v21 = vsub.s32 0, %v329_v20 }
   0x7   :  { %1091 = vmatpush3.bf16.msra.mxu0 %v1158_v1  ;;  %247 = vst [vmem:[#allocation2 + $0xa8] sm:$0xff] %v1175_v10  ;;  %249 = vst [vmem:[#allocation2 + $0x90] sm:$0xff] %v1175_v10  ;;  %1141 = vmatprep.subr.bf16.mxu1 %v1168_v12  ;;  %v1172_v16 = vld [vmem:[%s1642_s5 + $0x28] sm:$0xff]   ;;  %v1173_v17 = vld [vmem:[%s1642_s5 + $0x30] sm:$0xff]   ;;  %v382_v22 = vsub.s32 1, %v329_v20  ;;  %v434_v25 = vsub.s32 2, %v329_v20 }
   0x8   :  { %250 = vst [vmem:[#allocation2 + $0x98] sm:$0xff] %v1175_v10  ;;  %251 = vst [vmem:[#allocation2 + $0x130] sm:$0xff] %v1175_v10  ;;  %1108 = vmatprep.subr.bf16.mxu0 %v1167_v11  ;;  %v1174_v18 = vld [vmem:[%s1642_s5 + $0x38] sm:$0xff]   ;;  %v310_v23 = vld [vmem:[%s1643_s3] sm:$0xff]  ;;  %v538_v41 = vsub.s32 4, %v329_v20  ;;  %v695_v42 = vsub.s32 7, %v329_v20 }
   0x9   :  { %252 = vst [vmem:[#allocation2 + $0x138] sm:$0xff] %v1175_v10  ;;  %257 = vst [vmem:[#allocation2 + $0x40] sm:$0x1] %v1175_v10  ;;  %v1281_v24 = vrot.slane %v310_v23, %v330_v21  ;;  %v364_v27 = vld [vmem:[#allocation2 + $0x1] sm:$0xff]  ;;  %v1283_v28 = vrot.slane %v310_v23, %v382_v22  ;;  %v1288_v31 = vld [vmem:[%s1644_s2] ss:$0 sm:$0xff]  ;;  %v1292_v34 = vrot.slane %v310_v23, %v434_v25 }
   0xa   :  { %1093 = vmatmul.mubr.msk.bf16.vlgmr.msra.gmra.mrb[0].mxu0 %vm106_vm0, %v1160_v3  ;;  %258 = vst [vmem:[#allocation2 + $0x50] sm:$0x1] %v1175_v10  ;;  %259 = vst [vmem:[#allocation2 + $0x60] sm:$0x1] %v1175_v10  ;;  %1149 = vmatpush3.bf16.msra.mxu1 %v1168_v12  ;;  %v486_v46 = vsub.s32 3, %v329_v20  ;;  %v590_v47 = vsub.s32 5, %v329_v20  ;;  %v1302_v59 = vrot.slane %v310_v23, %v538_v41 }
   0xb   :  { %1096 = vmatprep.mubr.msk.bf16.mxu0 %vm106_vm0, %v1161_v4  ;;  %260 = vst [vmem:[#allocation2 + $0x70] sm:$0x1] %v1175_v10  ;;  %261 = vst [vmem:[#allocation2 + $0x80] sm:$0x1] %v1175_v10  ;;  %1109 = vmatpush3.bf16.msra.mxu0 %v1167_v11  ;;  %v384_v33 = vmul.f32 %v1283_v28, %v364_v27  ;;  %v643_v48 = vsub.s32 6, %v329_v20  ;;  %v1304_v60 = vrot.slane %v310_v23, %v695_v42 }
   0xc   :  { %264 = vst [vmem:[#allocation2 + $0xb0] sm:$0x1] %v1175_v10  ;;  %265 = vst [vmem:[#allocation2 + $0xc0] sm:$0x1] %v1175_v10  ;;  %1110 = vmatprep.subr.bf16.mxu0 %v1168_v12  ;;  %1142 = vmatprep.subr.bf16.mxu1 %v1169_v13  ;;  %v1311_v2 = vld [vmem:[%s1643_s3 + $0x8] ss:$0 sm:$0xff]  ;;  %v1313_v4 = vrot.slane %v310_v23, %v486_v46 }
   0xd   :  { %266 = vst [vmem:[#allocation2 + $0xd0] sm:$0x1] %v1175_v10  ;;  %267 = vst [vmem:[#allocation2 + $0xe0] sm:$0x1] %v1175_v10  ;;  %v1306_v1 = vrot.slane %v310_v23, %v643_v48 }
   0xe   :  { %268 = vst [vmem:[#allocation2 + $0xf0] sm:$0x1] %v1175_v10  ;;  %269 = vst [vmem:[#allocation2 + $0x100] sm:$0x1] %v1175_v10  ;;  %1150 = vmatpush3.bf16.msra.mxu1 %v1169_v13  ;;  %v372_v30 = vld [vmem:[#allocation2 + $0xa1] sm:$0xff] }
   0xf   :  { %270 = vst [vmem:[#allocation2 + $0x110] sm:$0x1] %v1175_v10  ;;  %271 = vst [vmem:[#allocation2 + $0x120] sm:$0x1] %v1175_v10  ;;  %1111 = vmatpush3.bf16.msra.mxu0 %v1168_v12  ;;  %1143 = vmatprep.subr.bf16.mxu1 %v1170_v14  ;;  %v392_v38 = vmul.f32 %v1283_v28, %v372_v30  ;;  %v684_v62 = vld [vmem:[#allocation2 + $0x91] sm:$0xff] }
  0x10   :  { %277 = vst [vmem:[#allocation2 + $0x49] sm:$0x1] %v1175_v10  ;;  %278 = vst [vmem:[#allocation2 + $0x59] sm:$0x1] %v1175_v10  ;;  %1112 = vmatprep.subr.bf16.mxu0 %v1169_v13 }
  0x11   :  { %279 = vst [vmem:[#allocation2 + $0x69] sm:$0x1] %v1175_v10  ;;  %280 = vst [vmem:[#allocation2 + $0x79] sm:$0x1] %v1175_v10 }
  0x12   :  { %1097 = vmatmul.mubr.msk.bf16.gmra.mrb[4].mxu0 %vm106_vm0, %v1162_v5  ;;  %281 = vst [vmem:[#allocation2 + $0x89] sm:$0x1] %v1175_v10  ;;  %284 = vst [vmem:[#allocation2 + $0xb9] sm:$0x1] %v1175_v10  ;;  %1151 = vmatpush3.bf16.msra.mxu1 %v1170_v14  ;;  %v1315_v5 = vrot.slane %v310_v23, %v590_v47 }
  0x13   :  { %1100 = vmatprep.mubr.msk.bf16.mxu0 %vm106_vm0, %v1163_v6  ;;  %285 = vst [vmem:[#allocation2 + $0xc9] sm:$0x1] %v1175_v10  ;;  %286 = vst [vmem:[#allocation2 + $0xd9] sm:$0x1] %v1175_v10  ;;  %1113 = vmatpush3.bf16.msra.mxu0 %v1169_v13 }
  0x14   :  { %287 = vst [vmem:[#allocation2 + $0xe9] sm:$0x1] %v1175_v10  ;;  %288 = vst [vmem:[#allocation2 + $0xf9] sm:$0x1] %v1175_v10  ;;  %1114 = vmatprep.subr.bf16.mxu0 %v1170_v14  ;;  %1144 = vmatprep.subr.bf16.mxu1 %v1171_v15 }
  0x15   :  { %289 = vst [vmem:[#allocation2 + $0x109] sm:$0x1] %v1175_v10  ;;  %290 = vst [vmem:[#allocation2 + $0x119] sm:$0x1] %v1175_v10 }
  0x16   :  { %291 = vst [vmem:[#allocation2 + $0x129] sm:$0x1] %v1175_v10  ;;  %253 = vst [vmem:[#allocation2] sm:$0x1] %v1175_v10  ;;  %1152 = vmatpush3.bf16.msra.mxu1 %v1171_v15 }
  0x17   :  { %273 = vst [vmem:[#allocation2 + $0x9] sm:$0x1] %v1175_v10  ;;  %262 = vst [vmem:[#allocation2 + $0x90] sm:$0x1] %v1175_v10  ;;  %1115 = vmatpush3.bf16.msra.mxu0 %v1170_v14  ;;  %1145 = vmatprep.subr.bf16.mxu1 %v1172_v16 }
  0x18   :  { %263 = vst [vmem:[#allocation2 + $0xa0] sm:$0x1] %v1175_v10  ;;  %272 = vst [vmem:[#allocation2 + $0x130] sm:$0x1] %v1175_v10  ;;  %1116 = vmatprep.subr.bf16.mxu0 %v1171_v15 }
  0x19   :  { %282 = vst [vmem:[#allocation2 + $0x99] sm:$0x1] %v1175_v10  ;;  %283 = vst [vmem:[#allocation2 + $0xa9] sm:$0x1] %v1175_v10 }
  0x1a   :  { %1101 = vmatmul.mubr.msk.bf16.gmra.mrb[8].mxu0 %vm106_vm0, %v1164_v7  ;;  %292 = vst [vmem:[#allocation2 + $0x139] sm:$0x1] %v1175_v10  ;;  %1153 = vmatpush3.bf16.msra.mxu1 %v1172_v16 }
  0x1b   :  { %1104 = vmatprep.mubr.msk.bf16.mxu0 %vm106_vm0, %v1165_v8  ;;  %1117 = vmatpush3.bf16.msra.mxu0 %v1171_v15  ;;  %v1321_v8 = vmul.f32 %v1304_v60, %v684_v62 }
  0x1c   :  { %1118 = vmatprep.subr.bf16.mxu0 %v1172_v16  ;;  %1146 = vmatprep.subr.bf16.mxu1 %v1173_v17 }
  0x1d   :  { %v312_v26 = vld [vmem:[#allocation2] sm:$0xff] }
  0x1e   :  { %1154 = vmatpush3.bf16.msra.mxu1 %v1173_v17  ;;  %v332_v32 = vmul.f32 %v1281_v24, %v312_v26  ;;  %v416_v36 = vld [vmem:[#allocation2 + $0x2] sm:$0xff]  ;;  %v632_v61 = vld [vmem:[#allocation2 + $0x90] sm:$0xff] }
  0x1f   :  { %1119 = vmatpush3.bf16.msra.mxu0 %v1172_v16  ;;  %1147 = vmatprep.subr.bf16.mxu1 %v1174_v18  ;;  %v320_v29 = vld [vmem:[#allocation2 + $0xa0] sm:$0xff]  ;;  %v436_v53 = vmul.f32 %v1292_v34, %v416_v36  ;;  %v1318_v7 = vmul.f32 %v1306_v1, %v632_v61 }
  0x20   :  { %1120 = vmatprep.subr.bf16.mxu0 %v1173_v17  ;;  %v340_v37 = vmul.f32 %v1281_v24, %v320_v29  ;;  %v424_v43 = vld [vmem:[#allocation2 + $0xa2] sm:$0xff]  ;;  %v400_v52 = vadd.f32 %v384_v33, %v332_v32  ;;  %v736_v63 = vld [vmem:[#allocation2 + $0x92] sm:$0xff] }
  0x21   :  { %v444_v57 = vmul.f32 %v1292_v34, %v424_v43 }
  0x22   :  { %1105 = vmatmul.mubr.msk.bf16.gmra.mrb[12].mxu0 %vm106_vm0, %v1166_v9  ;;  %1155 = vmatpush3.bf16.msra.mxu1 %v1174_v18  ;;  %v408_v56 = vadd.f32 %v392_v38, %v340_v37  ;;  %v452_v3 = vadd.f32 %v436_v53, %v400_v52  ;;  %v1324_v9 = vmul.f32 %v1311_v2, %v736_v63 }
  0x23   :  { %1121 = vmatpush3.bf16.msra.mxu0 %v1173_v17 }
  0x24   :  { %1122 = vmatprep.subr.bf16.mxu0 %v1174_v18  ;;  %v1326_v10 = vadd.f32 %v444_v57, %v408_v56 }
  0x27   :  { %1123 = vmatpush3.bf16.msra.mxu0 %v1174_v18 }
  0xdd   :  { %v1094_v35 = vpop.f32.mrb[0].mxu0 }
  0xde   :  { %v174_v39 = vadd.f32 %v1094_v35, %v1288_v31  ;;  %v165_v40 = vpop.f32.mrb[1].mxu0 }
  0xdf   :  { %v166_v44 = vadd.f32 %v1288_v31, %v165_v40  ;;  %v1095_v45 = vpop.f32.mrb[2].mxu0 }
  0xe0   :  { %v230_v49 = vmax.f32 %v174_v39, 0.0  ;;  %v177_v50 = vadd.f32 %v1095_v45, %v1288_v31  ;;  %v168_v51 = vpop.f32.mrb[3].mxu0 }
  0xe1   :  { %v228_v54 = vmax.f32 %v166_v44, 0.0  ;;  %v169_v55 = vadd.f32 %v1288_v31, %v168_v51 }
  0xe2   :  { %296 = vst [vmem:[#allocation2 + $0x31] sm:$0xff] %v230_v49  ;;  %v231_v58 = vmax.f32 %v177_v50, 0.0  ;;  %v1330_v13 = vmul.f32 %v1304_v60, %v230_v49  ;;  %v387_v14 = vmul.f32 %v1283_v28, %v230_v49  ;;  %v1334_v15 = vmul.f32 %v1302_v59, %v230_v49 }
  0xe3   :  { %294 = vst [vmem:[#allocation2 + $0x11] sm:$0xff] %v228_v54  ;;  %v229_v0 = vmax.f32 %v169_v55, 0.0  ;;  %v385_v18 = vmul.f32 %v1283_v28, %v228_v54  ;;  %v540_v19 = vmul.f32 %v1302_v59, %v228_v54 }
  0xe4   :  { %297 = vst [vmem:[#allocation2 + $0x41] sm:$0xff] %v231_v58  ;;  %v1340_v20 = vmul.f32 %v1302_v59, %v231_v58  ;;  %v1346_v25 = vmul.f32 %v1304_v60, %v231_v58  ;;  %v1349_v26 = vmul.f32 %v1283_v28, %v231_v58 }
  0xe5   :  { %295 = vst [vmem:[#allocation2 + $0x21] sm:$0xff] %v229_v0  ;;  %v1098_v6 = vpop.f32.mrb[4].mxu0  ;;  %v541_v30 = vmul.f32 %v1302_v59, %v229_v0  ;;  %v1356_v33 = vmul.f32 %v1304_v60, %v229_v0  ;;  %v386_v41 = vmul.f32 %v1283_v28, %v229_v0 }
  0xe6   :  { %v190_v11 = vadd.f32 %v1098_v6, %v1288_v31  ;;  %v181_v12 = vpop.f32.mrb[5].mxu0 }
  0xe7   :  { %v182_v16 = vadd.f32 %v1288_v31, %v181_v12  ;;  %v1099_v17 = vpop.f32.mrb[6].mxu0 }
  0xe8   :  { %v1342_v21 = vmax.f32 %v190_v11, 0.0  ;;  %v193_v22 = vadd.f32 %v1099_v17, %v1288_v31  ;;  %v184_v23 = vpop.f32.mrb[7].mxu0 }
  0xe9   :  { %v1351_v27 = vmax.f32 %v182_v16, 0.0  ;;  %v185_v29 = vadd.f32 %v1288_v31, %v184_v23  ;;  %v626_v32 = vld [vmem:[#allocation2 + $0x30] sm:$0xff] }
  0xea   :  { %v730_v35 = vld [vmem:[#allocation2 + $0x32] sm:$0xff]  ;;  %300 = vst [vmem:[#allocation2 + $0x71] sm:$0xff] %v1342_v21  ;;  %v1359_v36 = vmax.f32 %v193_v22, 0.0  ;;  %v1362_v39 = vmul.f32 %v1306_v1, %v626_v32  ;;  %v335_v40 = vmul.f32 %v626_v32, %v1281_v24  ;;  %v490_v56 = vmul.f32 %v626_v32, %v1313_v4 }
  0xeb   :  { %v313_v37 = vld [vmem:[#allocation2 + $0x10] sm:$0xff]  ;;  %298 = vst [vmem:[#allocation2 + $0x51] sm:$0xff] %v1351_v27  ;;  %v1367_v42 = vmax.f32 %v185_v29, 0.0  ;;  %v1372_v45 = vmul.f32 %v1311_v2, %v730_v35  ;;  %v439_v51 = vmul.f32 %v730_v35, %v1292_v34  ;;  %v471_v16 = vld [vmem:[#allocation2 + $0x40] sm:$0xff] }
  0xec   :  { %v417_v38 = vld [vmem:[#allocation2 + $0x12] sm:$0xff]  ;;  %v333_v43 = vmul.f32 %v1281_v24, %v313_v37  ;;  %v488_v44 = vmul.f32 %v1313_v4, %v313_v37  ;;  %301 = vst [vmem:[#allocation2 + $0x81] sm:$0xff] %v1359_v36  ;;  %v469_v47 = vld [vmem:[#allocation2 + $0x20] sm:$0xff]  ;;  %v403_v50 = vadd.f32 %v387_v14, %v335_v40 }
  0xed   :  { %v437_v46 = vmul.f32 %v1292_v34, %v417_v38  ;;  %v573_v48 = vld [vmem:[#allocation2 + $0x22] sm:$0xff]  ;;  %v592_v49 = vmul.f32 %v1315_v5, %v417_v38  ;;  %299 = vst [vmem:[#allocation2 + $0x61] sm:$0xff] %v1367_v42  ;;  %v1102_v52 = vpop.f32.mrb[8].mxu0  ;;  %v489_v54 = vmul.f32 %v1313_v4, %v469_v47  ;;  %v645_v62 = vmul.f32 %v1306_v1, %v469_v47 }
  0xee   :  { %v401_v53 = vadd.f32 %v385_v18, %v333_v43  ;;  %v504_v55 = vadd.f32 %v488_v44, %v452_v3  ;;  %v206_v57 = vadd.f32 %v1102_v52, %v1288_v31  ;;  %v197_v58 = vpop.f32.mrb[9].mxu0  ;;  %v593_v61 = vmul.f32 %v1315_v5, %v573_v48  ;;  %v575_v40 = vld [vmem:[#allocation2 + $0x42] sm:$0xff] }
  0xef   :  { %v334_v63 = vmul.f32 %v469_v47, %v1281_v24  ;;  %v198_v0 = vadd.f32 %v1288_v31, %v197_v58  ;;  %v1103_v6 = vpop.f32.mrb[10].mxu0  ;;  %v438_v14 = vmul.f32 %v573_v48, %v1292_v34  ;;  %v455_v23 = vadd.f32 %v439_v51, %v403_v50 }
  0xf0   :  { %v453_v11 = vadd.f32 %v437_v46, %v401_v53  ;;  %v556_v12 = vadd.f32 %v540_v19, %v504_v55  ;;  %v1387_v3 = vmax.f32 %v206_v57, 0.0  ;;  %v209_v17 = vadd.f32 %v1103_v6, %v1288_v31  ;;  %v200_v18 = vpop.f32.mrb[11].mxu0 }
  0xf1   :  { %v402_v22 = vadd.f32 %v386_v41, %v334_v63  ;;  %v1390_v29 = vmax.f32 %v198_v0, 0.0  ;;  %v201_v32 = vadd.f32 %v1288_v31, %v200_v18  ;;  %v749_v43 = vmul.f32 %v1311_v2, %v573_v48 }
  0xf2   :  { %v505_v37 = vadd.f32 %v489_v54, %v453_v11  ;;  %v608_v38 = vadd.f32 %v592_v49, %v556_v12  ;;  %304 = vst [vmem:[#allocation2 + $0xd1] sm:$0xff] %v1387_v3  ;;  %v1394_v19 = vmax.f32 %v209_v17, 0.0  ;;  %v491_v46 = vmul.f32 %v1313_v4, %v471_v16  ;;  %v628_v47 = vld [vmem:[#allocation2 + $0x50] sm:$0xff] }
  0xf3   :  { %v454_v44 = vadd.f32 %v438_v14, %v402_v22  ;;  %302 = vst [vmem:[#allocation2 + $0xb1] sm:$0xff] %v1390_v29  ;;  %v1399_v41 = vmax.f32 %v201_v32, 0.0  ;;  %v594_v52 = vmul.f32 %v730_v35, %v1315_v5  ;;  %v595_v54 = vmul.f32 %v1315_v5, %v575_v40 }
  0xf4   :  { %v557_v50 = vadd.f32 %v541_v30, %v505_v37  ;;  %v661_v51 = vadd.f32 %v645_v62, %v608_v38  ;;  %305 = vst [vmem:[#allocation2 + $0xe1] sm:$0xff] %v1394_v19  ;;  %v507_v53 = vadd.f32 %v491_v46, %v455_v23  ;;  %v647_v48 = vmul.f32 %v1306_v1, %v471_v16  ;;  %v1416_v62 = vld [vmem:[%s1645_s4] ss:$0 sm:$0xff] }
  0xf5   :  { %v506_v49 = vadd.f32 %v490_v56, %v454_v44  ;;  %303 = vst [vmem:[#allocation2 + $0xc1] sm:$0xff] %v1399_v41  ;;  %v1106_v55 = vpop.f32.mrb[12].mxu0  ;;  %v648_v63 = vmul.f32 %v1306_v1, %v628_v47  ;;  %v700_v30 = vmul.f32 %v1304_v60, %v1351_v27  ;;  %v336_v17 = vmul.f32 %v471_v16, %v1281_v24 }
  0xf6   :  { %v609_v57 = vadd.f32 %v593_v61, %v557_v50  ;;  %v713_v58 = vadd.f32 %v1356_v33, %v661_v51  ;;  %v1411_v35 = vadd.f32 %v1106_v55, %v1288_v31  ;;  %v213_v56 = vpop.f32.mrb[13].mxu0  ;;  %v559_v61 = vadd.f32 %v1340_v20, %v507_v53  ;;  %v473_v55 = vld [vmem:[#allocation2 + $0x60] sm:$0xff] }
  0xf7   :  { %v558_v0 = vadd.f32 %v1334_v15, %v506_v49  ;;  %v751_v33 = vmul.f32 %v1311_v2, %v575_v40  ;;  %v214_v6 = vadd.f32 %v1288_v31, %v213_v56  ;;  %v1107_v11 = vpop.f32.mrb[14].mxu0  ;;  %v732_v15 = vld [vmem:[#allocation2 + $0x52] sm:$0xff]  ;;  %v337_v50 = vmul.f32 %v628_v47, %v1281_v24 }
  0xf8   :  { %v662_v12 = vadd.f32 %v1362_v39, %v609_v57  ;;  %v765_v14 = vadd.f32 %v749_v43, %v713_v58  ;;  %v242_v18 = vmax.f32 %v1411_v35, 0.0  ;;  %v225_v22 = vadd.f32 %v1107_v11, %v1288_v31  ;;  %v216_v23 = vpop.f32.mrb[15].mxu0 }
  0xf9   :  { %v610_v32 = vadd.f32 %v594_v52, %v558_v0  ;;  %v611_v37 = vadd.f32 %v595_v54, %v559_v61  ;;  %v1426_v38 = vmax.f32 %v214_v6, 0.0  ;;  %v217_v20 = vadd.f32 %v1288_v31, %v216_v23 }
  0xfa   :  { %v714_v44 = vadd.f32 %v1330_v13, %v662_v12  ;;  %v788_v46 = vadd.f32 %v1416_v62, %v765_v14  ;;  %308 = vst [vmem:[#allocation2 + $0x111] sm:$0xff] %v242_v18  ;;  %v243_v39 = vmax.f32 %v225_v22, 0.0  ;;  %v752_v31 = vmul.f32 %v1311_v2, %v732_v15  ;;  %v630_v22 = vld [vmem:[#allocation2 + $0x70] sm:$0xff] }
  0xfb   :  { %v663_v16 = vadd.f32 %v647_v48, %v610_v32  ;;  %v664_v43 = vadd.f32 %v648_v63, %v611_v37  ;;  %306 = vst [vmem:[#allocation2 + $0xf1] sm:$0xff] %v1426_v38  ;;  %v1435_v51 = vmax.f32 %v217_v20, 0.0  ;;  %v389_v13 = vmul.f32 %v1283_v28, %v1351_v27 }
  0xfc   :  { %v766_v52 = vadd.f32 %v1372_v45, %v714_v44  ;;  %309 = vst [vmem:[#allocation2 + $0x121] sm:$0xff] %v243_v39  ;;  %v404_v54 = vadd.f32 %v1349_v26, %v336_v17  ;;  %v440_v48 = vmul.f32 %v575_v40, %v1292_v34  ;;  %v441_v45 = vmul.f32 %v732_v15, %v1292_v34 }
  0xfd   :  { %v715_v49 = vadd.f32 %v1346_v25, %v663_v16  ;;  %v716_v53 = vadd.f32 %v700_v30, %v664_v43  ;;  %307 = vst [vmem:[#allocation2 + $0x101] sm:$0xff] %v1435_v51  ;;  %v405_v58 = vadd.f32 %v389_v13, %v337_v50  ;;  %v492_v63 = vmul.f32 %v628_v47, %v1313_v4  ;;  %v577_v25 = vld [vmem:[#allocation2 + $0x62] sm:$0xff] }
  0xfe   :  { %v789_v57 = vadd.f32 %v1416_v62, %v766_v52  ;;  %v804_v56 = vmax.f32 %v788_v46, 0.0  ;;  %v456_v6 = vadd.f32 %v440_v48, %v404_v54  ;;  %v493_v26 = vmul.f32 %v1313_v4, %v473_v55  ;;  %v734_v52 = vld [vmem:[#allocation2 + $0x72] sm:$0xff] }
  0xff   :  { %v767_v0 = vadd.f32 %v751_v33, %v715_v49  ;;  %v768_v61 = vadd.f32 %v752_v31, %v716_v53  ;;  %v457_v11 = vadd.f32 %v441_v45, %v405_v58  ;;  %v544_v40 = vmul.f32 %v1302_v59, %v1351_v27  ;;  %v475_v58 = vld [vmem:[#allocation2 + $0x80] sm:$0xff] }
 0x100   :  { %v805_v30 = vmax.f32 %v789_v57, 0.0  ;;  %v508_v17 = vadd.f32 %v492_v63, %v456_v6  ;;  %v545_v47 = vmul.f32 %v1302_v59, %v1367_v42  ;;  %v596_v32 = vmul.f32 %v732_v15, %v1315_v5 }
 0x101   :  { %v790_v12 = vadd.f32 %v1416_v62, %v767_v0  ;;  %v791_v14 = vadd.f32 %v1416_v62, %v768_v61  ;;  %v509_v23 = vadd.f32 %v493_v26, %v457_v11  ;;  %v597_v37 = vmul.f32 %v1315_v5, %v577_v25  ;;  %v579_v11 = vld [vmem:[#allocation2 + $0x82] sm:$0xff] }
 0x102   :  { %v820_v33 = vpack.c.bf16 %v805_v30, %v804_v56  ;;  %v560_v46 = vadd.f32 %v544_v40, %v508_v17  ;;  %v649_v27 = vmul.f32 %v1306_v1, %v473_v55  ;;  %v650_v16 = vmul.f32 %v1306_v1, %v630_v22 }
 0x103   :  { %v806_v20 = vmax.f32 %v790_v12, 0.0  ;;  %v807_v44 = vmax.f32 %v791_v14, 0.0  ;;  %v561_v39 = vadd.f32 %v545_v47, %v509_v23  ;;  %v701_v43 = vmul.f32 %v1304_v60, %v1367_v42  ;;  %v321_v14 = vld [vmem:[#allocation2 + $0xb0] sm:$0xff] }
 0x104   :  { %1124 = vmatprep.mubr.bf16.mxu0 %v820_v33  ;;  %v702_v50 = vmul.f32 %v1304_v60, %v1342_v21  ;;  %v612_v15 = vadd.f32 %v596_v32, %v560_v46  ;;  %v753_v13 = vmul.f32 %v1311_v2, %v577_v25  ;;  %v338_v49 = vmul.f32 %v473_v55, %v1281_v24 }
 0x105   :  { %v821_v31 = vpack.c.bf16 %v807_v44, %v806_v20  ;;  %v613_v53 = vadd.f32 %v597_v37, %v561_v39  ;;  %v339_v54 = vmul.f32 %v630_v22, %v1281_v24  ;;  %v390_v48 = vmul.f32 %v1283_v28, %v1367_v42  ;;  %v425_v20 = vld [vmem:[#allocation2 + $0xb2] sm:$0xff]  ;;  %v477_v39 = vld [vmem:[#allocation2 + $0xc0] sm:$0xff] }
 0x106   :  { %v391_v57 = vmul.f32 %v1283_v28, %v1342_v21  ;;  %v665_v45 = vadd.f32 %v649_v27, %v612_v15  ;;  %v754_v63 = vmul.f32 %v1311_v2, %v734_v52  ;;  %v442_v56 = vmul.f32 %v577_v25, %v1292_v34 }
 0x107   :  { %1125 = vmatmul.mubr.bf16.vlgmr.msra.gmra.mrb[16].mxu0 %v821_v31  ;;  %v443_v0 = vmul.f32 %v734_v52, %v1292_v34  ;;  %v666_v61 = vadd.f32 %v650_v16, %v613_v53  ;;  %v406_v55 = vadd.f32 %v390_v48, %v338_v49  ;;  %v494_v30 = vmul.f32 %v630_v22, %v1313_v4 }
 0x108   :  { %v407_v6 = vadd.f32 %v391_v57, %v339_v54  ;;  %v717_v26 = vadd.f32 %v701_v43, %v665_v45  ;;  %v495_v42 = vmul.f32 %v1313_v4, %v475_v58  ;;  %v546_v40 = vmul.f32 %v1302_v59, %v1342_v21  ;;  %v581_v57 = vld [vmem:[#allocation2 + $0xc2] sm:$0xff] }
 0x109   :  { %v547_v12 = vmul.f32 %v1302_v59, %v1359_v36  ;;  %v718_v17 = vadd.f32 %v702_v50, %v666_v61  ;;  %v458_v25 = vadd.f32 %v442_v56, %v406_v55  ;;  %v598_v33 = vmul.f32 %v734_v52, %v1315_v5 }
 0x10a   :  { %v459_v47 = vadd.f32 %v443_v0, %v407_v6  ;;  %v769_v23 = vadd.f32 %v753_v13, %v717_v26  ;;  %v599_v32 = vmul.f32 %v1315_v5, %v579_v11  ;;  %v651_v22 = vmul.f32 %v1306_v1, %v475_v58  ;;  %v634_v0 = vld [vmem:[#allocation2 + $0xd0] sm:$0xff] }
 0x10b   :  { %v703_v37 = vmul.f32 %v1304_v60, %v1359_v36  ;;  %v770_v44 = vadd.f32 %v754_v63, %v718_v17  ;;  %v510_v21 = vadd.f32 %v494_v30, %v458_v25  ;;  %v341_v27 = vmul.f32 %v1281_v24, %v321_v14 }
 0x10c   :  { %v511_v46 = vadd.f32 %v495_v42, %v459_v47  ;;  %v792_v16 = vadd.f32 %v1416_v62, %v769_v23  ;;  %v755_v43 = vmul.f32 %v1311_v2, %v579_v11  ;;  %v393_v50 = vmul.f32 %v1283_v28, %v1390_v29  ;;  %v738_v23 = vld [vmem:[#allocation2 + $0xd2] sm:$0xff] }
 0x10d   :  { %v496_v52 = vmul.f32 %v1313_v4, %v321_v14  ;;  %v793_v31 = vadd.f32 %v1416_v62, %v770_v44  ;;  %v562_v15 = vadd.f32 %v546_v40, %v510_v21  ;;  %v445_v13 = vmul.f32 %v1292_v34, %v425_v20 }
 0x10e   :  { %v563_v36 = vadd.f32 %v547_v12, %v511_v46  ;;  %v409_v49 = vadd.f32 %v393_v50, %v341_v27  ;;  %v497_v53 = vmul.f32 %v1313_v4, %v477_v39  ;;  %v548_v48 = vmul.f32 %v1302_v59, %v1390_v29 }
 0x10f   :  { %v512_v54 = vadd.f32 %v496_v52, %v1326_v10  ;;  %v808_v58 = vmax.f32 %v792_v16, 0.0  ;;  %v809_v45 = vmax.f32 %v793_v31, 0.0  ;;  %v614_v63 = vadd.f32 %v598_v33, %v562_v15 }
 0x110   :  { %v615_v56 = vadd.f32 %v599_v32, %v563_v36  ;;  %v461_v61 = vadd.f32 %v445_v13, %v409_v49  ;;  %v549_v55 = vmul.f32 %v1302_v59, %v1399_v41  ;;  %v600_v30 = vmul.f32 %v1315_v5, %v425_v20 }
 0x111   :  { %v564_v6 = vadd.f32 %v548_v48, %v512_v54  ;;  %v822_v11 = vpack.c.bf16 %v809_v45, %v808_v58  ;;  %v667_v26 = vadd.f32 %v651_v22, %v614_v63  ;;  %v601_v42 = vmul.f32 %v1315_v5, %v581_v57 }
 0x112   :  { %v668_v10 = vadd.f32 %v1318_v7, %v615_v56  ;;  %v513_v29 = vadd.f32 %v497_v53, %v461_v61  ;;  %v653_v12 = vmul.f32 %v1306_v1, %v477_v39  ;;  %v654_v14 = vmul.f32 %v1306_v1, %v634_v0  ;;  %v583_v61 = vld [vmem:[#allocation2 + $0xe2] sm:$0xff] }
 0x113   :  { %v616_v40 = vadd.f32 %v600_v30, %v564_v6  ;;  %1128 = vmatprep.mubr.bf16.mxu1 %v822_v11  ;;  %v719_v17 = vadd.f32 %v703_v37, %v667_v26  ;;  %v705_v47 = vmul.f32 %v1304_v60, %v1399_v41  ;;  %v706_v33 = vmul.f32 %v1304_v60, %v1387_v3  ;;  %v636_v30 = vld [vmem:[#allocation2 + $0xf0] sm:$0xff] }
 0x114   :  { %v720_v25 = vadd.f32 %v1321_v8, %v668_v10  ;;  %v565_v7 = vadd.f32 %v549_v55, %v513_v29  ;;  %v757_v22 = vmul.f32 %v1311_v2, %v581_v57  ;;  %v342_v20 = vmul.f32 %v477_v39, %v1281_v24 }
 0x115   :  { %v669_v32 = vadd.f32 %v653_v12, %v616_v40  ;;  %v771_v44 = vadd.f32 %v755_v43, %v719_v17  ;;  %v343_v37 = vmul.f32 %v634_v0, %v1281_v24  ;;  %v394_v8 = vmul.f32 %v1283_v28, %v1399_v41 }
 0x116   :  { %v772_v21 = vadd.f32 %v1324_v9, %v720_v25  ;;  %v617_v46 = vadd.f32 %v601_v42, %v565_v7  ;;  %v758_v16 = vmul.f32 %v1311_v2, %v738_v23  ;;  %v395_v50 = vmul.f32 %v1283_v28, %v1387_v3  ;;  %v479_v9 = vld [vmem:[#allocation2 + $0xe0] sm:$0xff] }
 0x117   :  { %v721_v27 = vadd.f32 %v705_v47, %v669_v32  ;;  %v794_v52 = vadd.f32 %v1416_v62, %v771_v44  ;;  %v410_v39 = vadd.f32 %v394_v8, %v342_v20  ;;  %v446_v43 = vmul.f32 %v581_v57, %v1292_v34  ;;  %v740_v47 = vld [vmem:[#allocation2 + $0xf2] sm:$0xff] }
 0x118   :  { %v795_v31 = vadd.f32 %v1416_v62, %v772_v21  ;;  %v670_v15 = vadd.f32 %v654_v14, %v617_v46  ;;  %v411_v13 = vadd.f32 %v395_v50, %v343_v37  ;;  %v447_v41 = vmul.f32 %v738_v23, %v1292_v34 }
 0x119   :  { %v773_v36 = vadd.f32 %v757_v22, %v721_v27  ;;  %v810_v49 = vmax.f32 %v794_v52, 0.0  ;;  %v462_v54 = vadd.f32 %v446_v43, %v410_v39  ;;  %v498_v48 = vmul.f32 %v634_v0, %v1313_v4  ;;  %v481_v27 = vld [vmem:[#allocation2 + $0x100] sm:$0xff] }
 0x11a   :  { %v811_v53 = vmax.f32 %v795_v31, 0.0  ;;  %v722_v58 = vadd.f32 %v706_v33, %v670_v15  ;;  %v463_v63 = vadd.f32 %v447_v41, %v411_v13  ;;  %v499_v56 = vmul.f32 %v1313_v4, %v479_v9 }
 0x11b   :  { %v796_v45 = vadd.f32 %v1416_v62, %v773_v36  ;;  %v514_v57 = vadd.f32 %v498_v48, %v462_v54  ;;  %v550_v6 = vmul.f32 %v1302_v59, %v1387_v3  ;;  %v551_v10 = vmul.f32 %v1302_v59, %v1394_v19 }
 0x11c   :  { %v823_v55 = vpack.c.bf16 %v811_v53, %v810_v49  ;;  %v774_v11 = vadd.f32 %v758_v16, %v722_v58  ;;  %v515_v26 = vadd.f32 %v499_v56, %v463_v63  ;;  %v602_v0 = vmul.f32 %v738_v23, %v1315_v5  ;;  %v585_v49 = vld [vmem:[#allocation2 + $0x102] sm:$0xff]  ;;  %v638_v53 = vld [vmem:[#allocation2 + $0x110] sm:$0xff] }
 0x11d   :  { %v812_v42 = vmax.f32 %v796_v45, 0.0  ;;  %v566_v29 = vadd.f32 %v550_v6, %v514_v57  ;;  %v603_v40 = vmul.f32 %v1315_v5, %v583_v61  ;;  %v655_v12 = vmul.f32 %v1306_v1, %v479_v9 }
 0x11e   :  { %1129 = vmatmul.mubr.bf16.vlgmr.msra.gmra.mrb[0].mxu1 %v823_v55  ;;  %v797_v14 = vadd.f32 %v1416_v62, %v774_v11  ;;  %v567_v17 = vadd.f32 %v551_v10, %v515_v26  ;;  %v656_v3 = vmul.f32 %v1306_v1, %v636_v30  ;;  %v707_v25 = vmul.f32 %v1304_v60, %v1394_v19  ;;  %v379_v55 = vld [vmem:[#allocation2 + $0x111] sm:$0xff] }
 0x11f   :  { %v618_v33 = vadd.f32 %v602_v0, %v566_v29  ;;  %v708_v23 = vmul.f32 %v1304_v60, %v1426_v38  ;;  %v344_v7 = vmul.f32 %v479_v9, %v1281_v24  ;;  %v345_v32 = vmul.f32 %v636_v30, %v1281_v24  ;;  %v742_v0 = vld [vmem:[#allocation2 + $0x112] sm:$0xff] }
 0x120   :  { %v813_v22 = vmax.f32 %v797_v14, 0.0  ;;  %v619_v20 = vadd.f32 %v603_v40, %v567_v17  ;;  %v396_v44 = vmul.f32 %v1283_v28, %v1394_v19  ;;  %v397_v21 = vmul.f32 %v1283_v28, %v1426_v38 }
 0x121   :  { %v671_v37 = vadd.f32 %v655_v12, %v618_v33  ;;  %v448_v8 = vmul.f32 %v583_v61, %v1292_v34  ;;  %v449_v46 = vmul.f32 %v740_v47, %v1292_v34  ;;  %v500_v16 = vmul.f32 %v636_v30, %v1313_v4  ;;  %v483_v33 = vld [vmem:[#allocation2 + $0x120] sm:$0xff] }
 0x122   :  { %v824_v50 = vpack.c.bf16 %v813_v22, %v812_v42  ;;  %v672_v52 = vadd.f32 %v656_v3, %v619_v20  ;;  %v412_v31 = vadd.f32 %v396_v44, %v344_v7  ;;  %v413_v39 = vadd.f32 %v397_v21, %v345_v32  ;;  %v535_v21 = vld [vmem:[#allocation2 + $0x121] sm:$0xff] }
 0x123   :  { %v723_v43 = vadd.f32 %v707_v25, %v671_v37  ;;  %v759_v9 = vmul.f32 %v1311_v2, %v583_v61  ;;  %v760_v19 = vmul.f32 %v1311_v2, %v740_v47  ;;  %v501_v41 = vmul.f32 %v1313_v4, %v481_v27 }
 0x124   :  { %1132 = vmatprep.mubr.bf16.mxu1 %v824_v50  ;;  %v724_v15 = vadd.f32 %v708_v23, %v672_v52  ;;  %v464_v36 = vadd.f32 %v448_v8, %v412_v31  ;;  %v465_v13 = vadd.f32 %v449_v46, %v413_v39  ;;  %v552_v48 = vmul.f32 %v1302_v59, %v1426_v38  ;;  %v587_v31 = vld [vmem:[#allocation2 + $0x122] sm:$0xff] }
 0x125   :  { %v775_v54 = vadd.f32 %v759_v9, %v723_v43  ;;  %v553_v58 = vmul.f32 %v1302_v59, %v1435_v51  ;;  %v604_v61 = vmul.f32 %v740_v47, %v1315_v5  ;;  %v605_v6 = vmul.f32 %v1315_v5, %v585_v49 }
 0x126   :  { %v776_v45 = vadd.f32 %v760_v19, %v724_v15  ;;  %v516_v63 = vadd.f32 %v500_v16, %v464_v36  ;;  %v517_v56 = vadd.f32 %v501_v41, %v465_v13  ;;  %v657_v30 = vmul.f32 %v1306_v1, %v481_v27 }
 0x127   :  { %v798_v57 = vadd.f32 %v1416_v62, %v775_v54  ;;  %v658_v11 = vmul.f32 %v1306_v1, %v638_v53  ;;  %v346_v42 = vmul.f32 %v481_v27, %v1281_v24  ;;  %v347_v40 = vmul.f32 %v638_v53, %v1281_v24  ;;  %v640_v27 = vld [vmem:[#allocation2 + $0x130] sm:$0xff] }
 0x128   :  { %v799_v26 = vadd.f32 %v1416_v62, %v776_v45  ;;  %v568_v38 = vadd.f32 %v552_v48, %v516_v63  ;;  %v569_v10 = vadd.f32 %v553_v58, %v517_v56  ;;  %v398_v12 = vmul.f32 %v1283_v28, %v1435_v51  ;;  %v744_v48 = vld [vmem:[#allocation2 + $0x132] sm:$0xff] }
 0x129   :  { %v814_v29 = vmax.f32 %v798_v57, 0.0  ;;  %v399_v14 = vmul.f32 %v1283_v28, %v379_v55  ;;  %v709_v47 = vmul.f32 %v1304_v60, %v1435_v51  ;;  %v450_v32 = vmul.f32 %v585_v49, %v1292_v34 }
 0x12a   :  { %v815_v17 = vmax.f32 %v799_v26, 0.0  ;;  %v620_v3 = vadd.f32 %v604_v61, %v568_v38  ;;  %v621_v25 = vadd.f32 %v605_v6, %v569_v10  ;;  %v414_v23 = vadd.f32 %v398_v12, %v346_v42 }
 0x12b   :  { %v415_v7 = vadd.f32 %v399_v14, %v347_v40  ;;  %v451_v22 = vmul.f32 %v742_v0, %v1292_v34  ;;  %v710_v28 = vmul.f32 %v1304_v60, %v242_v18  ;;  %v502_v46 = vmul.f32 %v638_v53, %v1313_v4 }
 0x12c   :  { %v825_v20 = vpack.c.bf16 %v815_v17, %v814_v29  ;;  %v673_v24 = vadd.f32 %v657_v30, %v620_v3  ;;  %v674_v44 = vadd.f32 %v658_v11, %v621_v25  ;;  %v466_v37 = vadd.f32 %v450_v32, %v414_v23 }
 0x12d   :  { %v467_v8 = vadd.f32 %v451_v22, %v415_v7  ;;  %v503_v51 = vmul.f32 %v1313_v4, %v483_v33  ;;  %v761_v34 = vmul.f32 %v1311_v2, %v585_v49  ;;  %v762_v52 = vmul.f32 %v1311_v2, %v742_v0  ;;  %v692_v4 = vld [vmem:[#allocation2 + $0x131] sm:$0xff] }
 0x12e   :  { %1133 = vmatmul.mubr.bf16.gmra.mrb[4].mxu1 %v825_v20  ;;  %v725_v16 = vadd.f32 %v709_v47, %v673_v24  ;;  %v726_v50 = vadd.f32 %v710_v28, %v674_v44  ;;  %v518_v39 = vadd.f32 %v502_v46, %v466_v37  ;;  %v554_v18 = vmul.f32 %v1302_v59, %v379_v55 }
 0x12f   :  { %v519_v35 = vadd.f32 %v503_v51, %v467_v8  ;;  %v555_v43 = vmul.f32 %v1302_v59, %v535_v21  ;;  %v660_v15 = vmul.f32 %v1306_v1, %v640_v27  ;;  %v606_v41 = vmul.f32 %v742_v0, %v1315_v5 }
 0x130   :  { %v777_v9 = vadd.f32 %v761_v34, %v725_v16  ;;  %v778_v19 = vadd.f32 %v762_v52, %v726_v50  ;;  %v570_v36 = vadd.f32 %v554_v18, %v518_v39  ;;  %v607_v49 = vmul.f32 %v1315_v5, %v587_v31 }
 0x131   :  { %v571_v13 = vadd.f32 %v555_v43, %v519_v35  ;;  %v659_v59 = vmul.f32 %v1306_v1, %v483_v33  ;;  %v712_v63 = vmul.f32 %v1304_v60, %v692_v4  ;;  %v711_v6 = vmul.f32 %v1304_v60, %v535_v21  ;;  %v1053_v60 = vld [vmem:[%s1646_s6] ss:$0 sm:$0xff] }
 0x132   :  { %v800_v53 = vadd.f32 %v1416_v62, %v777_v9  ;;  %v801_v54 = vadd.f32 %v1416_v62, %v778_v19  ;;  %v622_v58 = vadd.f32 %v606_v41, %v570_v36  ;;  %v764_v30 = vmul.f32 %v1311_v2, %v744_v48 }
 0x133   :  { %v623_v45 = vadd.f32 %v607_v49, %v571_v13  ;;  %v763_v38 = vmul.f32 %v1311_v2, %v587_v31 }
 0x134   :  { %v816_v56 = vmax.f32 %v800_v53, 0.0  ;;  %v817_v61 = vmax.f32 %v801_v54, 0.0  ;;  %v675_v55 = vadd.f32 %v659_v59, %v622_v58 }
 0x135   :  { %v676_v57 = vadd.f32 %v660_v15, %v623_v45 }
 0x136   :  { %v826_v5 = vpack.c.bf16 %v817_v61, %v816_v56  ;;  %v727_v11 = vadd.f32 %v711_v6, %v675_v55 }
 0x137   :  { %v728_v26 = vadd.f32 %v712_v63, %v676_v57 }
 0x138   :  { %1136 = vmatprep.mubr.bf16.mxu1 %v826_v5  ;;  %v779_v10 = vadd.f32 %v763_v38, %v727_v11 }
 0x139   :  { %v780_v0 = vadd.f32 %v764_v30, %v728_v26 }
 0x13a   :  { %v802_v1 = vadd.f32 %v1416_v62, %v779_v10 }
 0x13b   :  { %v803_v42 = vadd.f32 %v1416_v62, %v780_v0 }
 0x13c   :  { %v818_v29 = vmax.f32 %v802_v1, 0.0 }
 0x13d   :  { %v819_v40 = vmax.f32 %v803_v42, 0.0 }
 0x13f   :  { %v827_v12 = vpack.c.bf16 %v819_v40, %v818_v29 }
 0x141   :  { %1137 = vmatmul.mubr.bf16.gmra.mrb[8].mxu1 %v827_v12 }
 0x1da   :  { %v1126_v14 = vpop.f32.mrb[16].mxu0 }
 0x1db   :  { %v942_v17 = vadd.f32 %v1126_v14, %v1053_v60  ;;  %v933_v3 = vpop.f32.mrb[17].mxu0 }
 0x1dc   :  { %v934_v25 = vadd.f32 %v1053_v60, %v933_v3  ;;  %v1127_v2 = vpop.f32.mrb[18].mxu0 }
 0x1dd   :  { %v998_v47 = vmax.f32 %v942_v17, 0.0  ;;  %v945_v33 = vadd.f32 %v1127_v2, %v1053_v60  ;;  %v936_v23 = vpop.f32.mrb[19].mxu0 }
 0x1de   :  { %v996_v7 = vmax.f32 %v934_v25, 0.0  ;;  %v937_v32 = vadd.f32 %v1053_v60, %v936_v23 }
 0x1df   :  { %1014 = vst [vmem:[%s1647_s7 + $0x10] sm:$0xff] %v998_v47  ;;  %v999_v62 = vmax.f32 %v945_v33, 0.0 }
 0x1e0   :  { %1012 = vst [vmem:[%s1647_s7] sm:$0xff] %v996_v7  ;;  %v997_v22 = vmax.f32 %v937_v32, 0.0 }
 0x1e1   :  { %1015 = vst [vmem:[%s1647_s7 + $0x18] sm:$0xff] %v999_v62 }
 0x1e2   :  { %1013 = vst [vmem:[%s1647_s7 + $0x8] sm:$0xff] %v997_v22 }
 0x1f1   :  { %v1130_v20 = vpop.f32.mrb[0].mxu1 }
 0x1f2   :  { %v958_v24 = vadd.f32 %v1130_v20, %v1053_v60  ;;  %v949_v44 = vpop.f32.mrb[1].mxu1 }
 0x1f3   :  { %v950_v28 = vadd.f32 %v1053_v60, %v949_v44  ;;  %v1131_v21 = vpop.f32.mrb[2].mxu1 }
 0x1f4   :  { %v1002_v37 = vmax.f32 %v958_v24, 0.0  ;;  %v961_v8 = vadd.f32 %v1131_v21, %v1053_v60  ;;  %v952_v46 = vpop.f32.mrb[3].mxu1 }
 0x1f5   :  { %v1000_v51 = vmax.f32 %v950_v28, 0.0  ;;  %v953_v27 = vadd.f32 %v1053_v60, %v952_v46 }
 0x1f6   :  { %1018 = vst [vmem:[%s1647_s7 + $0x30] sm:$0xff] %v1002_v37  ;;  %v1003_v16 = vmax.f32 %v961_v8, 0.0 }
 0x1f7   :  { %1016 = vst [vmem:[%s1647_s7 + $0x20] sm:$0xff] %v1000_v51  ;;  %v1001_v50 = vmax.f32 %v953_v27, 0.0 }
 0x1f8   :  { %1019 = vst [vmem:[%s1647_s7 + $0x38] sm:$0xff] %v1003_v16 }
 0x1f9   :  { %1017 = vst [vmem:[%s1647_s7 + $0x28] sm:$0xff] %v1001_v50 }
 0x201   :  { %v1134_v34 = vpop.f32.mrb[4].mxu1 }
 0x202   :  { %v974_v52 = vadd.f32 %v1134_v34, %v1053_v60  ;;  %v965_v31 = vpop.f32.mrb[5].mxu1 }
 0x203   :  { %v966_v39 = vadd.f32 %v1053_v60, %v965_v31  ;;  %v1135_v35 = vpop.f32.mrb[6].mxu1 }
 0x204   :  { %v1006_v18 = vmax.f32 %v974_v52, 0.0  ;;  %v977_v43 = vadd.f32 %v1135_v35, %v1053_v60  ;;  %v968_v9 = vpop.f32.mrb[7].mxu1 }
 0x205   :  { %v1004_v19 = vmax.f32 %v966_v39, 0.0  ;;  %v969_v15 = vadd.f32 %v1053_v60, %v968_v9 }
 0x206   :  { %1022 = vst [vmem:[%s1647_s7 + $0x50] sm:$0xff] %v1006_v18  ;;  %v1007_v4 = vmax.f32 %v977_v43, 0.0 }
 0x207   :  { %1020 = vst [vmem:[%s1647_s7 + $0x40] sm:$0xff] %v1004_v19  ;;  %v1005_v36 = vmax.f32 %v969_v15, 0.0 }
 0x208   :  { %1023 = vst [vmem:[%s1647_s7 + $0x58] sm:$0xff] %v1007_v4 }
 0x209   :  { %1021 = vst [vmem:[%s1647_s7 + $0x48] sm:$0xff] %v1005_v36 }
 0x214   :  { %v1138_v13 = vpop.f32.mrb[8].mxu1 }
 0x215   :  { %v990_v41 = vadd.f32 %v1138_v13, %v1053_v60  ;;  %v981_v49 = vpop.f32.mrb[9].mxu1 }
 0x216   :  { %v982_v53 = vadd.f32 %v1053_v60, %v981_v49  ;;  %v1139_v54 = vpop.f32.mrb[10].mxu1 }
 0x217   :  { %v1010_v48 = vmax.f32 %v990_v41, 0.0  ;;  %v993_v58 = vadd.f32 %v1139_v54, %v1053_v60  ;;  %v984_v45 = vpop.f32.mrb[11].mxu1 }
 0x218   :  { %v1008_v59 = vmax.f32 %v982_v53, 0.0  ;;  %v985_v63 = vadd.f32 %v1053_v60, %v984_v45 }
 0x219   :  { %1026 = vst [vmem:[%s1647_s7 + $0x70] sm:$0xff] %v1010_v48  ;;  %v1011_v56 = vmax.f32 %v993_v58, 0.0 }
 0x21a   :  { %1024 = vst [vmem:[%s1647_s7 + $0x60] sm:$0xff] %v1008_v59  ;;  %v1009_v61 = vmax.f32 %v985_v63, 0.0 }
 0x21b   :  { %1027 = vst [vmem:[%s1647_s7 + $0x78] sm:$0xff] %v1011_v56 }
 0x21c   :  { %1025 = vst [vmem:[%s1647_s7 + $0x68] sm:$0xff] %v1009_v61 }

</bundles_post_ra>
